<compile_context>
chip_gen: v7x
topology: tpu7x:2x2x1
jax: 0.10.0
libtpu: 0.0.40
codegen_flags: <defaults>
</compile_context>

<pallas_src>
import jax
import jax.numpy as jnp
from jax.experimental import pallas as pl
from jax.experimental.pallas import tpu as pltpu

EPS = 1e-5
_LANE = 128
_SUBLANE = 8
_TARGET_STEP_BYTES = 4 * 1024 * 1024   # in+out HBM traffic per grid step
_MIN_STEPS = 8                          # >= 4 pipeline steps per core on 2-TC parts


def _round_up(n, m):
    return ((n + m - 1) // m) * m


def _vmem_capacity_bytes():
    try:
        return int(pltpu.get_tpu_info().vmem_capacity_bytes)
    except Exception:
        return 64 * 1024 * 1024  # conservative fallback: v7x per-TensorCore VMEM


def _make_ln_kernel(c, mask_lanes, has_bias):
    """Builds the LayerNorm kernel body.

    c          -- real channel count (divisor for the statistics).
    mask_lanes -- True when the Cp-wide block has lanes >= c that must be
                  excluded from the sums (C not a multiple of 128).
    has_bias   -- whether a bias ref is passed.
    """
    inv_c = 1.0 / float(c)

    def kernel(*refs):
        if has_bias:
            x_ref, w_ref, b_ref, o_ref = refs
        else:
            x_ref, w_ref, o_ref = refs
            b_ref = None

        x = x_ref[...].astype(jnp.float32)          # (TM, Cp)
        if mask_lanes:
            lane = jax.lax.broadcasted_iota(jnp.int32, x.shape, dimension=1)
            valid = lane < c
            xm = jnp.where(valid, x, 0.0)           # garbage OOB lanes -> 0
        else:
            xm = x

        # Two-pass statistics: numerically safer than E[x^2]-mean^2 and free
        # here (tile is VMEM-resident, kernel is HBM-bandwidth bound).
        mean = jnp.sum(xm, axis=-1, keepdims=True) * inv_c
        d = x - mean
        if mask_lanes:
            d = jnp.where(valid, d, 0.0)
        var = jnp.sum(d * d, axis=-1, keepdims=True) * inv_c
        inv = jax.lax.rsqrt(var + EPS)

        y = (d * inv) * w_ref[...].astype(jnp.float32)
        if b_ref is not None:
            y = y + b_ref[...].astype(jnp.float32)
        # Full (TM, Cp) store keeps vreg->VMEM stores lane-dense; the HBM
        # writeback DMA masks the rows/lanes past the real (rows, C) extent.
        o_ref[...] = y.astype(o_ref.dtype)

    return kernel


def _pick_row_tile(rows, c_padded, itemsize, tile_vmem_budget):
    """Rows per grid step: byte-targeted, VMEM-bounded, >= _MIN_STEPS steps."""
    # HBM traffic per row (read x + write out).
    traffic_per_row = 2 * c_padded * itemsize
    # VMEM per row: double-buffered in + out blocks plus ~3 f32 temporaries.
    vmem_per_row = 2 * 2 * c_padded * itemsize + 3 * c_padded * 4

    tile = min(_TARGET_STEP_BYTES // traffic_per_row,
               tile_vmem_budget // vmem_per_row)
    tile = max(_SUBLANE, (tile // _SUBLANE) * _SUBLANE)
    # No point in a tile larger than the whole (sublane-rounded) problem.
    tile = min(tile, _round_up(rows, _SUBLANE))
    # Keep >= _MIN_STEPS grid steps when there's enough work so pipelining
    # (and core sharding on 2-TC parts) has something to overlap.
    if rows >= _MIN_STEPS * _SUBLANE:
        tile = min(tile, _round_up(pl.cdiv(rows, _MIN_STEPS), _SUBLANE))
    return tile


def layer_norm(x, weight, bias=None):
    """LayerNorm over the last axis of x with learnable weight / optional bias."""
    orig_shape = x.shape
    C = orig_shape[-1]
    rows = 1
    for dim in orig_shape[:-1]:
        rows *= dim
    x2 = x.reshape(rows, C)                  # contiguous collapse: no copy

    # Lane-dense block width.  The activations are NOT padded: Pallas masks
    # the ragged DMAs, and the kernel masks the extra lanes in the sums.
    Cp = _round_up(C, _LANE)
    mask_lanes = Cp != C
    w2 = weight.reshape(1, C)
    b2 = None if bias is None else bias.reshape(1, C)
    if mask_lanes:                            # padding the (1, C) params is free
        w2 = jnp.pad(w2, ((0, 0), (0, Cp - C)))
        if b2 is not None:
            b2 = jnp.pad(b2, ((0, 0), (0, Cp - C)))

    vmem_cap = _vmem_capacity_bytes()
    # ~1/3 of physical VMEM for pipelined buffers + f32 temporaries:
    # ~21 MiB on v7x (64 MiB part), ~40 MiB on v5e/v6e (128 MiB parts).
    tile_vmem_budget = min(vmem_cap // 3, 40 * 1024 * 1024)
    vmem_limit = int(min(vmem_cap * 3 // 4, 96 * 1024 * 1024))

    itemsize = jnp.dtype(x.dtype).itemsize
    row_tile = _pick_row_tile(rows, Cp, itemsize, tile_vmem_budget)
    grid = (pl.cdiv(rows, row_tile),)

    x_spec = pl.BlockSpec((row_tile, Cp), lambda i: (i, 0))
    wb_spec = pl.BlockSpec((1, Cp), lambda i: (0, 0))   # revisited block
    out_spec = pl.BlockSpec((row_tile, Cp), lambda i: (i, 0))

    kernel = _make_ln_kernel(C, mask_lanes, bias is not None)
    if bias is None:
        in_specs = [x_spec, wb_spec]
        args = (x2, w2)
    else:
        in_specs = [x_spec, wb_spec, wb_spec]
        args = (x2, w2, b2)

    out = pl.pallas_call(
        kernel,
        out_shape=jax.ShapeDtypeStruct((rows, C), x.dtype),
        grid_spec=pltpu.PrefetchScalarGridSpec(
            num_scalar_prefetch=0,
            grid=grid,
            in_specs=in_specs,
            out_specs=out_spec,
        ),
        compiler_params=pltpu.CompilerParams(
            dimension_semantics=("parallel",),
            vmem_limit_bytes=vmem_limit,
        ),
    )(*args)

    return out.reshape(orig_shape)


def _reference(x, weight, bias):
    mean = jnp.mean(x, axis=-1, keepdims=True)
    var = jnp.mean((x - mean) ** 2, axis=-1, keepdims=True)
    y = (x - mean) / jnp.sqrt(var + EPS) * weight
    return y + bias if bias is not None else y


if __name__ == "__main__":
    B, T, C = 2, 8, 32  # small shapes consistent with a transformer LayerNorm(ndim=C)

    key = jax.random.PRNGKey(0)
    key_main, key_ragged = jax.random.split(key)
    x = jax.random.normal(key_main, (B, T, C), dtype=jnp.float32)

    # Deterministic parameter init matching nn.Module __init__:
    # weight = ones(ndim), bias = zeros(ndim)  (bias=True case)
    weight = jnp.ones((C,), dtype=jnp.float32)
    bias = jnp.zeros((C,), dtype=jnp.float32)

    out = layer_norm(x, weight, bias)
    jax.block_until_ready(out)

    # bias=False path (dedicated no-bias kernel, no zero-bias DMA).
    out_nobias = layer_norm(x, weight, None)
    jax.block_until_ready(out_nobias)

    ref = _reference(x, weight, bias)
    assert jnp.allclose(out, ref, atol=1e-5, rtol=1e-5)
    assert jnp.allclose(out_nobias, _reference(x, weight, None), atol=1e-5, rtol=1e-5)

    # Ragged rows (15, not a multiple of the tile) + ragged channels (32 < 128):
    # exercises the partial-block / lane-mask path that replaced jnp.pad.
    x_r = jax.random.normal(key_ragged, (3, 5, C), dtype=jnp.float32)
    out_r = layer_norm(x_r, weight, bias)
    jax.block_until_ready(out_r)
    assert jnp.allclose(out_r, _reference(x_r, weight, bias), atol=1e-5, rtol=1e-5)

    print("KERNEL_OK")
</pallas_src>

<mosaic_0001>
module attributes {stable_mosaic.version = 11 : i64} {
  func.func @kernel(%arg0: i32, %arg1: memref<16x128xf32, #tpu.memory_space<vmem>>, %arg2: memref<1x128xf32, #tpu.memory_space<vmem>>, %arg3: memref<1x128xf32, #tpu.memory_space<vmem>>, %arg4: memref<16x128xf32, #tpu.memory_space<vmem>>) attributes {dimension_semantics = [#tpu.dimension_semantics<parallel>], iteration_bounds = array<i64: 1>, scalar_prefetch = 0 : i64, scratch_operands = 0 : i64, tpu.core_type = #tpu.core_type<tc>, window_params = [{transform_indices = @transform_0, window_bounds = array<i64: 16, 128>}, {pipeline_mode = #tpu.pipeline_mode<synchronous>, transform_indices = @transform_1, window_bounds = array<i64: 1, 128>}, {pipeline_mode = #tpu.pipeline_mode<synchronous>, transform_indices = @transform_2, window_bounds = array<i64: 1, 128>}, {transform_indices = @transform_3, window_bounds = array<i64: 16, 128>}]} {
    %c0 = arith.constant 0 : index
    %c0_0 = arith.constant 0 : index
    %0 = vector.load %arg1[%c0, %c0_0] : memref<16x128xf32, #tpu.memory_space<vmem>>, vector<16x128xf32>
    %1 = tpu.iota {dimensions = array<i32: 1>} : vector<16x128xi32>
    %c32_i32 = arith.constant 32 : i32
    %2 = vector.broadcast %c32_i32 : i32 to vector<16x128xi32>
    %3 = arith.cmpi slt, %1, %2 : vector<16x128xi32>
    %cst = arith.constant 0.000000e+00 : f32
    %4 = vector.broadcast %cst : f32 to vector<16x128xf32>
    %5 = arith.select %3, %0, %4 : vector<16x128xi1>, vector<16x128xf32>
    %cst_1 = arith.constant dense<0.000000e+00> : vector<16xf32>
    %6 = vector.multi_reduction <add>, %5, %cst_1 [1] : vector<16x128xf32> to vector<16xf32>
    %7 = vector.shape_cast %6 : vector<16xf32> to vector<16x1xf32>
    %cst_2 = arith.constant 3.125000e-02 : f32
    %8 = vector.broadcast %cst_2 : f32 to vector<16x1xf32>
    %9 = arith.mulf %7, %8 : vector<16x1xf32>
    %10 = vector.broadcast %9 : vector<16x1xf32> to vector<16x128xf32>
    %11 = arith.subf %0, %10 : vector<16x128xf32>
    %cst_3 = arith.constant 0.000000e+00 : f32
    %12 = vector.broadcast %cst_3 : f32 to vector<16x128xf32>
    %13 = arith.select %3, %11, %12 : vector<16x128xi1>, vector<16x128xf32>
    %14 = arith.mulf %13, %13 : vector<16x128xf32>
    %cst_4 = arith.constant dense<0.000000e+00> : vector<16xf32>
    %15 = vector.multi_reduction <add>, %14, %cst_4 [1] : vector<16x128xf32> to vector<16xf32>
    %16 = vector.shape_cast %15 : vector<16xf32> to vector<16x1xf32>
    %cst_5 = arith.constant 3.125000e-02 : f32
    %17 = vector.broadcast %cst_5 : f32 to vector<16x1xf32>
    %18 = arith.mulf %16, %17 : vector<16x1xf32>
    %cst_6 = arith.constant 9.99999974E-6 : f32
    %19 = vector.broadcast %cst_6 : f32 to vector<16x1xf32>
    %20 = arith.addf %18, %19 : vector<16x1xf32>
    %21 = math.rsqrt %20 : vector<16x1xf32>
    %22 = vector.broadcast %21 : vector<16x1xf32> to vector<16x128xf32>
    %23 = arith.mulf %13, %22 : vector<16x128xf32>
    %c0_7 = arith.constant 0 : index
    %c0_8 = arith.constant 0 : index
    %24 = vector.load %arg2[%c0_7, %c0_8] : memref<1x128xf32, #tpu.memory_space<vmem>>, vector<1x128xf32>
    %25 = vector.broadcast %24 : vector<1x128xf32> to vector<16x128xf32>
    %26 = arith.mulf %23, %25 : vector<16x128xf32>
    %c0_9 = arith.constant 0 : index
    %c0_10 = arith.constant 0 : index
    %27 = vector.load %arg3[%c0_9, %c0_10] : memref<1x128xf32, #tpu.memory_space<vmem>>, vector<1x128xf32>
    %28 = vector.broadcast %27 : vector<1x128xf32> to vector<16x128xf32>
    %29 = arith.addf %26, %28 : vector<16x128xf32>
    %c0_11 = arith.constant 0 : index
    %c0_12 = arith.constant 0 : index
    %30 = vector.load %arg4[%c0_11, %c0_12] : memref<16x128xf32, #tpu.memory_space<vmem>>, vector<16x128xf32>
    tpu.vector_store %arg4[%c0_11, %c0_12], %29 {strides = array<i32>} : memref<16x128xf32, #tpu.memory_space<vmem>>, vector<16x128xf32>,
    return
  }
  func.func @transform_0(%arg0: i32) -> (i32, i32) {
    %c0_i32 = arith.constant 0 : i32
    %c0_i32_0 = arith.constant 0 : i32
    return %arg0, %c0_i32 : i32, i32
  }
  func.func @transform_1(%arg0: i32) -> (i32, i32) {
    %c0_i32 = arith.constant 0 : i32
    %c0_i32_0 = arith.constant 0 : i32
    %c0_i32_1 = arith.constant 0 : i32
    return %c0_i32, %c0_i32_0 : i32, i32
  }
  func.func @transform_2(%arg0: i32) -> (i32, i32) {
    %c0_i32 = arith.constant 0 : i32
    %c0_i32_0 = arith.constant 0 : i32
    %c0_i32_1 = arith.constant 0 : i32
    return %c0_i32, %c0_i32_0 : i32, i32
  }
  func.func @transform_3(%arg0: i32) -> (i32, i32) {
    %c0_i32 = arith.constant 0 : i32
    %c0_i32_0 = arith.constant 0 : i32
    return %arg0, %c0_i32 : i32, i32
  }
}

</mosaic_0001>

<bundles_post_ra>
// kernel: tpu_custom_call.1
= control target key start
LH: loop header
LB: loop body
LE: loop exit
PB: predicated region body
PF: predicated region fallthrough
CT: control target
= control target key end

     0   :  { %8 = vsyncpa [#allocation3], 0  ;;  %s219_s0 = inlined_call_operand.hbm [shape: f32[16,32], index: 0, kind: input, shape index: {}]   ;;  %s220_s1 = inlined_call_operand.vmem [shape: f32[1,128], index: 1, kind: input, shape index: {}]   ;;  %s221_s2 = inlined_call_operand.vmem [shape: f32[1,128], index: 2, kind: input, shape index: {}]   ;;  %s222_s3 = inlined_call_operand.hbm [shape: f32[16,32], index: 3, kind: output, shape index: {}]  }
   0x1   :  { %9 = vsyncpa [#allocation4], 0  ;;  %s155_s12 = smov [#allocation2]   ;;  %s107_s16 = scalar_lea.hbm %s219_s0, 256 }
   0x2   :  { %s15_s13 = sshll.u32 %s155_s12, 4  ;;  %p108_p0 = scmp.ne.s32.totalorder %s219_s0, %s107_s16  ;;  %s16_s13 = int_to_ptr.vmem [resolvable:$true] %s15_s13 }
   0x3   :  { %p111_p1 = scmp.lt.u32.totalorder %s107_s16, %s219_s0 }
   0x5   :  { %p113_p2 = pnand %p111_p1, %p108_p0 }
   0x7   :  { %116 = shalt.err (!%p113_p2)
}
   0x8   :  { %s117_s21 = scalar_lea.vmem %s16_s13, 256  ;;  %p122_p4 = scmp.lt.s32.totalorder %s16_s13, %s16_s13 }
   0x9   :  { %p118_p3 = scmp.ne.s32.totalorder %s16_s13, %s117_s21  ;;  %p123_p5 = scmp.lt.s32.totalorder %s117_s21, %s117_s21 }
   0xb   :  { %p124_p6 = por %p123_p5, %p122_p4 }
   0xd   :  { %p125_p7 = pnand %p124_p6, %p118_p3 }
   0xf   :  { %128 = shalt.err (!%p125_p7)
}
  0x10   :  { %s156_s22 = smov 128   ;;  %s157_s23 = smov 8  }
  0x11   :  { %21 = dma.hbm_to_vmem [thread:$0]  %s219_s0, 256, %s16_s13, [#allocation3], %s156_s22, %s156_s22, %s157_s23  }
  0x12   :  { %151 = dma.done.wait [#allocation3], 256  }
  0x13   :  { %152 = vsyncadd [#allocation3], 4294967040  ;;  %v31_v0 = vlaneseq  ;;  %v29_v2 = vld [vmem:[#allocation2] sm:$0xff]  ;;  %v30_v3 = vld [vmem:[#allocation2 + $0x8] sm:$0xff]  ;;  %s158_s29 = smov [#allocation5]  }
  0x14   :  { %v97_v23 = vld [vmem:[%s220_s1] ss:$0 sm:$0xff]  ;;  %s85_s30 = sshll.u32 %s158_s29, 4  ;;  %s86_s30 = int_to_ptr.vmem [resolvable:$true] %s85_s30 }
  0x15   :  { %v32_v1 = vand.u32 127, %v31_v0  ;;  %v98_v25 = vld [vmem:[%s221_s2] ss:$0 sm:$0xff]  ;;  %s129_s4 = scalar_lea.vmem %s86_s30, 256  ;;  %p134_p9 = scmp.lt.s32.totalorder %s86_s30, %s86_s30 }
  0x16   :  { %p130_p8 = scmp.ne.s32.totalorder %s86_s30, %s129_s4  ;;  %p135_p10 = scmp.lt.s32.totalorder %s129_s4, %s129_s4 }
  0x17   :  { %vm33_vm0 = vcmp.lt.s32.totalorder %v32_v1, 32 }
  0x18   :  { %v34_v4 = vsel %vm33_vm0, %v29_v2, 0.0  ;;  %v35_v5 = vsel %vm33_vm0, %v30_v3, 0.0  ;;  %p136_p11 = por %p135_p10, %p134_p9 }
  0x19   :  { %36 = vadd.xlane.f32.xlu0 %v34_v4 }
  0x1a   :  { %p137_p12 = pnand %p136_p11, %p130_p8 }
  0x1d   :  { %38 = vadd.xlane.f32.xlu0 %v35_v5 }
  0xa6   :  { %v37_v6 = vpop.xlane.xlu0 %36 }
  0xa7   :  { %v40_v7 = vmul.f32 0.03125, %v37_v6 }
  0xa9   :  { %v42_v8 = vsub.f32 %v29_v2, %v40_v7 }
  0xaa   :  { %v39_v9 = vpop.xlane.xlu0 %38 }
  0xab   :  { %v41_v10 = vmul.f32 0.03125, %v39_v9  ;;  %v44_v11 = vsel %vm33_vm0, %v42_v8, 0.0 }
  0xac   :  { %v46_v12 = vmul.f32 %v44_v11, %v44_v11 }
  0xad   :  { %v43_v13 = vsub.f32 %v30_v3, %v41_v10 }
  0xae   :  { %48 = vadd.xlane.f32.xlu1 %v46_v12 }
  0xaf   :  { %v45_v14 = vsel %vm33_vm0, %v43_v13, 0.0 }
  0xb0   :  { %v47_v15 = vmul.f32 %v45_v14, %v45_v14 }
  0xb2   :  { %50 = vadd.xlane.f32.xlu1 %v47_v15 }
 0x13b   :  { %v49_v16 = vpop.xlane.xlu1 %48 }
 0x13c   :  { %v52_v17 = vmul.f32 0.03125, %v49_v16 }
 0x13e   :  { %v54_v18 = vadd.f32 1e-05, %v52_v17 }
 0x13f   :  { %v51_v19 = vpop.xlane.xlu1 %50 }
 0x140   :  { %103 = vrsqrt.f32 %v54_v18  ;;  %v53_v20 = vmul.f32 0.03125, %v51_v19 }
 0x142   :  { %v55_v21 = vadd.f32 1e-05, %v53_v20 }
 0x144   :  { %105 = vrsqrt.f32 %v55_v21 }
 0x14a   :  { %v104_v22 = vpop.eup %103 }
 0x14b   :  { %v58_v24 = vmul.f32 %v104_v22, %v44_v11 }
 0x14d   :  { %v67_v26 = vmul.f32 %v97_v23, %v58_v24 }
 0x14e   :  { %v106_v27 = vpop.eup %105 }
 0x14f   :  { %v59_v28 = vmul.f32 %v106_v27, %v45_v14  ;;  %v76_v29 = vadd.f32 %v98_v25, %v67_v26 }
 0x151   :  { %v68_v30 = vmul.f32 %v97_v23, %v59_v28  ;;  %78 = vst [vmem:[#allocation5] sm:$0xff] %v76_v29 }
 0x153   :  { %v77_v31 = vadd.f32 %v98_v25, %v68_v30 }
 0x155   :  { %79 = vst [vmem:[#allocation5 + $0x8] sm:$0xff] %v77_v31 }
 0x156   :  { %140 = shalt.err (!%p137_p12)
}
 0x157   :  { %s141_s5 = scalar_lea.hbm %s222_s3, 256 }
 0x158   :  { %p142_p13 = scmp.ne.s32.totalorder %s222_s3, %s141_s5  ;;  %p145_p0 = scmp.lt.u32.totalorder %s141_s5, %s222_s3 }
 0x15a   :  { %p147_p1 = pnand %p145_p0, %p142_p13 }
 0x15c   :  { %150 = shalt.err (!%p147_p1)
}
 0x15d   :  { %91 = dma.vmem_to_hbm [thread:$0]  %s86_s30, 256, %s222_s3, [#allocation4], %s156_s22, %s156_s22, %s157_s23  }
 0x15e   :  { %153 = dma.done.wait [#allocation4], 256  }
 0x15f   :  { %154 = vsyncadd [#allocation4], 4294967040 }
 0x160   :  { %95 = vsyncpa [#allocation3], 1 }
 0x161   :  { %96 = vsyncpa [#allocation4], 1 }

</bundles_post_ra>
